<compile_context>
chip_gen: v5e
topology: v5e:2x2
jax: 0.10.0
libtpu: 0.0.40
codegen_flags: <defaults>
</compile_context>

<pallas_src>
import functools

import jax
import jax.numpy as jnp
from jax.experimental import pallas as pl
from jax.experimental.pallas import tpu as pltpu

TILE_B_MAX = 512   # max batch rows per grid step (sweet spot per measured tiling data)
_SUBLANE = 8       # f32 sublane granularity for the batch (second-to-last) dim


def _autoencoder_kernel(
    x_ref,
    w1_ref, w2_ref, w3_ref,   # encoder weights, native shapes
    w4_ref, w5_ref, w6_ref,   # decoder weights, native shapes
    b_ref,                    # packed biases: row j = bias of layer j+1, f32
    latent_ref, recon_ref,
):
    cdt = w1_ref.dtype  # matmul operand dtype (bf16 or f32); accumulation stays f32

    def layer(a, w_ref, bias_row, act):
        n = w_ref.shape[1]
        y = jnp.dot(a.astype(cdt), w_ref[...], preferred_element_type=jnp.float32)
        y = y + b_ref[bias_row:bias_row + 1, :n]     # (1, n) broadcast add, f32
        return act(y)

    relu = lambda t: jnp.maximum(t, 0.0)
    ident = lambda t: t

    x = x_ref[...].astype(jnp.float32)

    # ---- encoder ----  (Dropout -> identity in eval mode)
    h = layer(x, w1_ref, 0, relu)
    h = layer(h, w2_ref, 1, relu)
    z = layer(h, w3_ref, 2, jnp.tanh)
    latent_ref[...] = z.astype(latent_ref.dtype)

    # ---- decoder ----
    d = layer(z, w4_ref, 3, relu)
    d = layer(d, w5_ref, 4, relu)
    r = layer(d, w6_ref, 5, ident)
    recon_ref[...] = r.astype(recon_ref.dtype)


def _batch_tiling(batch):
    """Pick (tile_b, grid, padded_batch): big tiles, but >= 2 grid steps when possible
    so the parallel axis can feed both TensorCores on v7x."""
    pb = -(-batch // _SUBLANE) * _SUBLANE              # sublane-align the batch
    if pb >= 2 * TILE_B_MAX:
        tile = TILE_B_MAX
    elif pb >= 2 * _SUBLANE:
        tile = -(-pb // (2 * _SUBLANE)) * _SUBLANE     # ~half the batch, 8-aligned -> 2 tiles
    else:
        tile = pb
    grid = -(-pb // tile)
    return tile, grid, grid * tile


@functools.partial(jax.jit, static_argnames=("use_bf16",))
def state_autoencoder_forward(x, params, use_bf16=True):
    """x: [batch, input_dim] float32.  params: dict of (W, b) pairs (W: [in, out])."""
    batch, input_dim = x.shape
    latent_dim = params["w3"].shape[1]
    wdt = jnp.bfloat16 if use_bf16 else jnp.float32

    tile_b, grid_b, padded_batch = _batch_tiling(batch)
    xp = x if padded_batch == batch else jnp.pad(x, ((0, padded_batch - batch), (0, 0)))

    # Native-shape weights (no 128x128 padding); bf16 operands by default.
    ws = [params[f"w{i}"].astype(wdt) for i in range(1, 7)]

    # Pack the six bias vectors into one (8, bias_cols) f32 operand -> single DMA.
    out_dims = [params[f"w{i}"].shape[1] for i in range(1, 7)]
    bias_cols = max(128, -(-max(out_dims) // 128) * 128)
    bias = jnp.zeros((8, bias_cols), jnp.float32)
    for i in range(1, 7):
        b = params[f"b{i}"].reshape(-1)
        bias = bias.at[i - 1, : b.shape[0]].set(b.astype(jnp.float32))

    act_in_spec = pl.BlockSpec((tile_b, input_dim), lambda i: (i, 0))     # batch-tiled
    resident = lambda shape: pl.BlockSpec(shape, lambda i: (0, 0))        # VMEM-resident

    latent_p, recon_p = pl.pallas_call(
        _autoencoder_kernel,
        out_shape=(
            jax.ShapeDtypeStruct((padded_batch, latent_dim), jnp.float32),
            jax.ShapeDtypeStruct((padded_batch, input_dim), jnp.float32),
        ),
        grid=(grid_b,),
        in_specs=[act_in_spec]
        + [resident(w.shape) for w in ws]
        + [resident((8, bias_cols))],
        out_specs=(
            pl.BlockSpec((tile_b, latent_dim), lambda i: (i, 0)),
            pl.BlockSpec((tile_b, input_dim), lambda i: (i, 0)),
        ),
        compiler_params=pltpu.CompilerParams(
            dimension_semantics=("parallel",),   # megacore sharding on v7x
            vmem_limit_bytes=32 << 20,           # actual footprint << 1 MiB per step
        ),
    )(xp, *ws, bias)

    if padded_batch != batch:
        latent_p = latent_p[:batch]
        recon_p = recon_p[:batch]
    return latent_p, recon_p


def init_params(key, input_dim, latent_dim, hidden_dim):
    """Deterministic init mimicking PyTorch nn.Linear default (uniform +/-1/sqrt(fan_in))."""
    half = hidden_dim // 2
    layer_dims = [
        (input_dim, hidden_dim),   # enc 1
        (hidden_dim, half),        # enc 2
        (half, latent_dim),        # enc 3
        (latent_dim, half),        # dec 1
        (half, hidden_dim),        # dec 2
        (hidden_dim, input_dim),   # dec 3
    ]
    params = {}
    keys = jax.random.split(key, 2 * len(layer_dims))
    for i, (fan_in, fan_out) in enumerate(layer_dims):
        bound = 1.0 / jnp.sqrt(fan_in)
        w = jax.random.uniform(keys[2 * i], (fan_in, fan_out), jnp.float32, -bound, bound)
        b = jax.random.uniform(keys[2 * i + 1], (1, fan_out), jnp.float32, -bound, bound)
        params[f"w{i + 1}"] = w
        params[f"b{i + 1}"] = b
    return params


def reference_forward(x, params):
    """Plain-JAX reference identical to the PyTorch forward (eval mode)."""
    h = jnp.maximum(x @ params["w1"] + params["b1"], 0.0)
    h = jnp.maximum(h @ params["w2"] + params["b2"], 0.0)
    z = jnp.tanh(h @ params["w3"] + params["b3"])
    d = jnp.maximum(z @ params["w4"] + params["b4"], 0.0)
    d = jnp.maximum(d @ params["w5"] + params["b5"], 0.0)
    r = d @ params["w6"] + params["b6"]
    return z, r


if __name__ == "__main__":
    input_dim, latent_dim, hidden_dim = 32, 8, 32
    batch = 200  # not a tile multiple -> exercises batch padding + the 2-step parallel grid

    key = jax.random.PRNGKey(0)
    k_params, k_x = jax.random.split(key)
    params = init_params(k_params, input_dim, latent_dim, hidden_dim)
    x = jax.random.normal(k_x, (batch, input_dim), jnp.float32)

    ref_latent, ref_recon = reference_forward(x, params)

    # f32 matmul path: exact parity with the reference.
    latent, recon = state_autoencoder_forward(x, params, use_bf16=False)
    latent, recon = jax.block_until_ready((latent, recon))
    assert latent.shape == (batch, latent_dim)
    assert recon.shape == (batch, input_dim)
    assert jnp.allclose(latent, ref_latent, atol=1e-5, rtol=1e-5)
    assert jnp.allclose(recon, ref_recon, atol=1e-5, rtol=1e-5)

    # Default bf16 matmul-operand path (native MXU dtype on v5e/v6e/v7x):
    # f32 accumulation + f32 elementwise, tolerance loosened for weight rounding.
    latent_bf, recon_bf = state_autoencoder_forward(x, params)
    latent_bf, recon_bf = jax.block_until_ready((latent_bf, recon_bf))
    assert latent_bf.shape == (batch, latent_dim)
    assert recon_bf.shape == (batch, input_dim)
    assert jnp.allclose(latent_bf, ref_latent, atol=1e-1, rtol=1e-1)
    assert jnp.allclose(recon_bf, ref_recon, atol=1e-1, rtol=1e-1)

    print("KERNEL_OK")
</pallas_src>

<mosaic_0001>
module attributes {stable_mosaic.version = 11 : i64} {
  func.func @_autoencoder_kernel(%arg0: i32, %arg1: memref<104x32xf32, #tpu.memory_space<vmem>>, %arg2: memref<32x32xf32, #tpu.memory_space<vmem>>, %arg3: memref<32x16xf32, #tpu.memory_space<vmem>>, %arg4: memref<16x8xf32, #tpu.memory_space<vmem>>, %arg5: memref<8x16xf32, #tpu.memory_space<vmem>>, %arg6: memref<16x32xf32, #tpu.memory_space<vmem>>, %arg7: memref<32x32xf32, #tpu.memory_space<vmem>>, %arg8: memref<8x128xf32, #tpu.memory_space<vmem>>, %arg9: memref<104x8xf32, #tpu.memory_space<vmem>>, %arg10: memref<104x32xf32, #tpu.memory_space<vmem>>) attributes {dimension_semantics = [#tpu.dimension_semantics<parallel>], iteration_bounds = array<i64: 2>, scalar_prefetch = 0 : i64, scratch_operands = 0 : i64, tpu.core_type = #tpu.core_type<tc>, window_params = [{transform_indices = @transform_0, window_bounds = array<i64: 104, 32>}, {pipeline_mode = #tpu.pipeline_mode<synchronous>, transform_indices = @transform_1, window_bounds = array<i64: 32, 32>}, {pipeline_mode = #tpu.pipeline_mode<synchronous>, transform_indices = @transform_2, window_bounds = array<i64: 32, 16>}, {pipeline_mode = #tpu.pipeline_mode<synchronous>, transform_indices = @transform_3, window_bounds = array<i64: 16, 8>}, {pipeline_mode = #tpu.pipeline_mode<synchronous>, transform_indices = @transform_4, window_bounds = array<i64: 8, 16>}, {pipeline_mode = #tpu.pipeline_mode<synchronous>, transform_indices = @transform_5, window_bounds = array<i64: 16, 32>}, {pipeline_mode = #tpu.pipeline_mode<synchronous>, transform_indices = @transform_6, window_bounds = array<i64: 32, 32>}, {pipeline_mode = #tpu.pipeline_mode<synchronous>, transform_indices = @transform_7, window_bounds = array<i64: 8, 128>}, {transform_indices = @transform_8, window_bounds = array<i64: 104, 8>}, {transform_indices = @transform_9, window_bounds = array<i64: 104, 32>}]} {
    %c0 = arith.constant 0 : index
    %c0_0 = arith.constant 0 : index
    %0 = vector.load %arg1[%c0, %c0_0] : memref<104x32xf32, #tpu.memory_space<vmem>>, vector<104x32xf32>
    %c0_1 = arith.constant 0 : index
    %c0_2 = arith.constant 0 : index
    %1 = vector.load %arg2[%c0_1, %c0_2] : memref<32x32xf32, #tpu.memory_space<vmem>>, vector<32x32xf32>
    %cst = arith.constant dense<0.000000e+00> : vector<104x32xf32>
    %2 = tpu.matmul %0, %1, %cst {dimension_numbers = #tpu.dot_dimension_numbers<[1], [0], [0], [1], [0, 0, 1, 1], [], []>} : vector<104x32xf32>, vector<32x32xf32>, vector<104x32xf32> -> vector<104x32xf32>
    %c0_3 = arith.constant 0 : index
    %c0_4 = arith.constant 0 : index
    %3 = vector.load %arg8[%c0_3, %c0_4] : memref<8x128xf32, #tpu.memory_space<vmem>>, vector<1x32xf32>
    %4 = vector.broadcast %3 : vector<1x32xf32> to vector<104x32xf32>
    %5 = arith.addf %2, %4 : vector<104x32xf32>
    %cst_5 = arith.constant 0.000000e+00 : f32
    %6 = vector.broadcast %cst_5 : f32 to vector<104x32xf32>
    %7 = arith.maximumf %5, %6 : vector<104x32xf32>
    %c0_6 = arith.constant 0 : index
    %c0_7 = arith.constant 0 : index
    %8 = vector.load %arg3[%c0_6, %c0_7] : memref<32x16xf32, #tpu.memory_space<vmem>>, vector<32x16xf32>
    %cst_8 = arith.constant dense<0.000000e+00> : vector<104x16xf32>
    %9 = tpu.matmul %7, %8, %cst_8 {dimension_numbers = #tpu.dot_dimension_numbers<[1], [0], [0], [1], [0, 0, 1, 1], [], []>} : vector<104x32xf32>, vector<32x16xf32>, vector<104x16xf32> -> vector<104x16xf32>
    %c1 = arith.constant 1 : index
    %c0_9 = arith.constant 0 : index
    %10 = vector.load %arg8[%c1, %c0_9] : memref<8x128xf32, #tpu.memory_space<vmem>>, vector<1x16xf32>
    %11 = vector.broadcast %10 : vector<1x16xf32> to vector<104x16xf32>
    %12 = arith.addf %9, %11 : vector<104x16xf32>
    %cst_10 = arith.constant 0.000000e+00 : f32
    %13 = vector.broadcast %cst_10 : f32 to vector<104x16xf32>
    %14 = arith.maximumf %12, %13 : vector<104x16xf32>
    %c0_11 = arith.constant 0 : index
    %c0_12 = arith.constant 0 : index
    %15 = vector.load %arg4[%c0_11, %c0_12] : memref<16x8xf32, #tpu.memory_space<vmem>>, vector<16x8xf32>
    %cst_13 = arith.constant dense<0.000000e+00> : vector<104x8xf32>
    %16 = tpu.matmul %14, %15, %cst_13 {dimension_numbers = #tpu.dot_dimension_numbers<[1], [0], [0], [1], [0, 0, 1, 1], [], []>} : vector<104x16xf32>, vector<16x8xf32>, vector<104x8xf32> -> vector<104x8xf32>
    %c2 = arith.constant 2 : index
    %c0_14 = arith.constant 0 : index
    %17 = vector.load %arg8[%c2, %c0_14] : memref<8x128xf32, #tpu.memory_space<vmem>>, vector<1x8xf32>
    %18 = vector.broadcast %17 : vector<1x8xf32> to vector<104x8xf32>
    %19 = arith.addf %16, %18 : vector<104x8xf32>
    %20 = math.tanh %19 : vector<104x8xf32>
    %c0_15 = arith.constant 0 : index
    %c0_16 = arith.constant 0 : index
    %21 = vector.load %arg9[%c0_15, %c0_16] : memref<104x8xf32, #tpu.memory_space<vmem>>, vector<104x8xf32>
    tpu.vector_store %arg9[%c0_15, %c0_16], %20 {strides = array<i32>} : memref<104x8xf32, #tpu.memory_space<vmem>>, vector<104x8xf32>,
    %c0_17 = arith.constant 0 : index
    %c0_18 = arith.constant 0 : index
    %22 = vector.load %arg5[%c0_17, %c0_18] : memref<8x16xf32, #tpu.memory_space<vmem>>, vector<8x16xf32>
    %cst_19 = arith.constant dense<0.000000e+00> : vector<104x16xf32>
    %23 = tpu.matmul %20, %22, %cst_19 {dimension_numbers = #tpu.dot_dimension_numbers<[1], [0], [0], [1], [0, 0, 1, 1], [], []>} : vector<104x8xf32>, vector<8x16xf32>, vector<104x16xf32> -> vector<104x16xf32>
    %c3 = arith.constant 3 : index
    %c0_20 = arith.constant 0 : index
    %24 = vector.load %arg8[%c3, %c0_20] : memref<8x128xf32, #tpu.memory_space<vmem>>, vector<1x16xf32>
    %25 = vector.broadcast %24 : vector<1x16xf32> to vector<104x16xf32>
    %26 = arith.addf %23, %25 : vector<104x16xf32>
    %cst_21 = arith.constant 0.000000e+00 : f32
    %27 = vector.broadcast %cst_21 : f32 to vector<104x16xf32>
    %28 = arith.maximumf %26, %27 : vector<104x16xf32>
    %c0_22 = arith.constant 0 : index
    %c0_23 = arith.constant 0 : index
    %29 = vector.load %arg6[%c0_22, %c0_23] : memref<16x32xf32, #tpu.memory_space<vmem>>, vector<16x32xf32>
    %cst_24 = arith.constant dense<0.000000e+00> : vector<104x32xf32>
    %30 = tpu.matmul %28, %29, %cst_24 {dimension_numbers = #tpu.dot_dimension_numbers<[1], [0], [0], [1], [0, 0, 1, 1], [], []>} : vector<104x16xf32>, vector<16x32xf32>, vector<104x32xf32> -> vector<104x32xf32>
    %c4 = arith.constant 4 : index
    %c0_25 = arith.constant 0 : index
    %31 = vector.load %arg8[%c4, %c0_25] : memref<8x128xf32, #tpu.memory_space<vmem>>, vector<1x32xf32>
    %32 = vector.broadcast %31 : vector<1x32xf32> to vector<104x32xf32>
    %33 = arith.addf %30, %32 : vector<104x32xf32>
    %cst_26 = arith.constant 0.000000e+00 : f32
    %34 = vector.broadcast %cst_26 : f32 to vector<104x32xf32>
    %35 = arith.maximumf %33, %34 : vector<104x32xf32>
    %c0_27 = arith.constant 0 : index
    %c0_28 = arith.constant 0 : index
    %36 = vector.load %arg7[%c0_27, %c0_28] : memref<32x32xf32, #tpu.memory_space<vmem>>, vector<32x32xf32>
    %cst_29 = arith.constant dense<0.000000e+00> : vector<104x32xf32>
    %37 = tpu.matmul %35, %36, %cst_29 {dimension_numbers = #tpu.dot_dimension_numbers<[1], [0], [0], [1], [0, 0, 1, 1], [], []>} : vector<104x32xf32>, vector<32x32xf32>, vector<104x32xf32> -> vector<104x32xf32>
    %c5 = arith.constant 5 : index
    %c0_30 = arith.constant 0 : index
    %38 = vector.load %arg8[%c5, %c0_30] : memref<8x128xf32, #tpu.memory_space<vmem>>, vector<1x32xf32>
    %39 = vector.broadcast %38 : vector<1x32xf32> to vector<104x32xf32>
    %40 = arith.addf %37, %39 : vector<104x32xf32>
    %c0_31 = arith.constant 0 : index
    %c0_32 = arith.constant 0 : index
    %41 = vector.load %arg10[%c0_31, %c0_32] : memref<104x32xf32, #tpu.memory_space<vmem>>, vector<104x32xf32>
    tpu.vector_store %arg10[%c0_31, %c0_32], %40 {strides = array<i32>} : memref<104x32xf32, #tpu.memory_space<vmem>>, vector<104x32xf32>,
    return
  }
  func.func @transform_0(%arg0: i32) -> (i32, i32) {
    %c0_i32 = arith.constant 0 : i32
    %c0_i32_0 = arith.constant 0 : i32
    return %arg0, %c0_i32 : i32, i32
  }
  func.func @transform_1(%arg0: i32) -> (i32, i32) {
    %c0_i32 = arith.constant 0 : i32
    %c0_i32_0 = arith.constant 0 : i32
    %c0_i32_1 = arith.constant 0 : i32
    return %c0_i32, %c0_i32_0 : i32, i32
  }
  func.func @transform_2(%arg0: i32) -> (i32, i32) {
    %c0_i32 = arith.constant 0 : i32
    %c0_i32_0 = arith.constant 0 : i32
    %c0_i32_1 = arith.constant 0 : i32
    return %c0_i32, %c0_i32_0 : i32, i32
  }
  func.func @transform_3(%arg0: i32) -> (i32, i32) {
    %c0_i32 = arith.constant 0 : i32
    %c0_i32_0 = arith.constant 0 : i32
    %c0_i32_1 = arith.constant 0 : i32
    return %c0_i32, %c0_i32_0 : i32, i32
  }
  func.func @transform_4(%arg0: i32) -> (i32, i32) {
    %c0_i32 = arith.constant 0 : i32
    %c0_i32_0 = arith.constant 0 : i32
    %c0_i32_1 = arith.constant 0 : i32
    return %c0_i32, %c0_i32_0 : i32, i32
  }
  func.func @transform_5(%arg0: i32) -> (i32, i32) {
    %c0_i32 = arith.constant 0 : i32
    %c0_i32_0 = arith.constant 0 : i32
    %c0_i32_1 = arith.constant 0 : i32
    return %c0_i32, %c0_i32_0 : i32, i32
  }
  func.func @transform_6(%arg0: i32) -> (i32, i32) {
    %c0_i32 = arith.constant 0 : i32
    %c0_i32_0 = arith.constant 0 : i32
    %c0_i32_1 = arith.constant 0 : i32
    return %c0_i32, %c0_i32_0 : i32, i32
  }
  func.func @transform_7(%arg0: i32) -> (i32, i32) {
    %c0_i32 = arith.constant 0 : i32
    %c0_i32_0 = arith.constant 0 : i32
    %c0_i32_1 = arith.constant 0 : i32
    return %c0_i32, %c0_i32_0 : i32, i32
  }
  func.func @transform_8(%arg0: i32) -> (i32, i32) {
    %c0_i32 = arith.constant 0 : i32
    %c0_i32_0 = arith.constant 0 : i32
    return %arg0, %c0_i32 : i32, i32
  }
  func.func @transform_9(%arg0: i32) -> (i32, i32) {
    %c0_i32 = arith.constant 0 : i32
    %c0_i32_0 = arith.constant 0 : i32
    return %arg0, %c0_i32 : i32, i32
  }
}

</mosaic_0001>

<bundles_post_ra>
// kernel: state_autoencoder_forward.1
= control target key start
LH: loop header
LB: loop body
LE: loop exit
PB: predicated region body
PF: predicated region fallthrough
CT: control target
= control target key end

     0   :  { %s1335_s30 = smov 0   ;;  %s1578_s0 = inlined_call_operand.vmem [shape: f32[208,32], index: 0, kind: input, shape index: {}]   ;;  %s1579_s1 = inlined_call_operand.vmem [shape: f32[32,32], index: 1, kind: input, shape index: {}]   ;;  %s1580_s2 = inlined_call_operand.vmem [shape: f32[32,16], index: 2, kind: input, shape index: {}]   ;;  %s1581_s3 = inlined_call_operand.vmem [shape: f32[16,8], index: 3, kind: input, shape index: {}]   ;;  %s1582_s4 = inlined_call_operand.vmem [shape: f32[8,16], index: 4, kind: input, shape index: {}]   ;;  %s1583_s5 = inlined_call_operand.vmem [shape: f32[16,32], index: 5, kind: input, shape index: {}]   ;;  %s1584_s6 = inlined_call_operand.vmem [shape: f32[32,32], index: 6, kind: input, shape index: {}]   ;;  %s1585_s7 = inlined_call_operand.vmem [shape: f32[8,128], index: 7, kind: input, shape index: {}]   ;;  %s1586_s8 = inlined_call_operand.vmem [shape: f32[208,8], index: 8, kind: output, shape index: {0}]   ;;  %s1587_s9 = inlined_call_operand.vmem [shape: f32[208,32], index: 9, kind: output, shape index: {1}]  }
   0x1 LB: > { %s1146_s10 = sadd.s32 4294967295, %s1283_s30   ;;  %p1150_p0 = scmp.ge.s32.totalorder %s1283_s30, 1  ;;  %s1283_s30 = sphi %s1335_s30, %s20_s30  }
   0x2   : > { %p291_p1 = scmp.lt.s32.totalorder %s1283_s30, 3 }
   0x4   : > { %p292_p2 = pnand %p1150_p0, %p291_p1 }
   0x5   : > { %s332_s15 = smul.u32 (!%p292_p2), 13, %s1146_s10 }
   0x6   : > { %295 = sbr.rel (%p292_p2) target bundleno = 923 (0x39b), region = 52 }
   0x7   : > { %p333_p3 = scmp.lt.s32.totalorder (!%p292_p2), %s332_s15, 25 }
   0xb   : > { %v366_v0 = vld [vmem:[%s1579_s1 + $0x18] sm:$0xff]  ;;  %v365_v1 = vld [vmem:[%s1579_s1 + $0x10] sm:$0xff]  ;;  %v364_v2 = vld [vmem:[%s1579_s1 + $0x8] sm:$0xff]  ;;  %s1589_s15 = smov (!%p333_p3, %s332_s15), 25  ;;  %vm369_vm0 = vcmask 261120   ;;  %vm596_vm1 = vcmask 130048  }
   0xc   : > { %421 = vmatpush.msra.mxu0 %v366_v0  ;;  %v363_v3 = vld [vmem:[%s1579_s1] sm:$0xff]  ;;  %s1355_s20 = sshll.u32 %s1589_s15, 3  ;;  %v481_v13 = vld [vmem:[%s1580_s2 + $0x18] sm:$0xff]  ;;  %v480_v17 = vld [vmem:[%s1580_s2 + $0x10] sm:$0xff]  ;;  %vm705_vm2 = vcmask 64512  }
   0xd   : > { %s336_s23 = scalar_lea.vmem %s1578_s0, %s1355_s20  ;;  %535 = vmatpush.msra.mxu1 %v481_v13  ;;  %v479_v19 = vld [vmem:[%s1580_s2 + $0x8] sm:$0xff]  ;;  %v478_v20 = vld [vmem:[%s1580_s2] sm:$0xff]  ;;  %s1437_s27 = scalar_lea.vmem %s1586_s8, %s1355_s20 }
   0xe   : > { %422 = vmatpush.msra.mxu0 %v365_v1  ;;  %v350_v4 = vld [vmem:[%s336_s23] sm:$0xff]  ;;  %v351_v5 = vld [vmem:[%s336_s23 + $0x8] sm:$0xff]  ;;  %v352_v6 = vld [vmem:[%s336_s23 + $0x10] sm:$0xff]  ;;  %s1547_s29 = scalar_lea.vmem %s1587_s9, %s1355_s20 }
   0xf   : > { %v353_v7 = vld [vmem:[%s336_s23 + $0x18] sm:$0xff]  ;;  %v354_v8 = vld [vmem:[%s336_s23 + $0x20] sm:$0xff]  ;;  %v355_v9 = vld [vmem:[%s336_s23 + $0x28] sm:$0xff]  ;;  %536 = vmatpush.msra.mxu1 %v480_v17 }
  0x10   : > { %423 = vmatpush.msra.mxu0 %v364_v2  ;;  %v356_v10 = vld [vmem:[%s336_s23 + $0x30] sm:$0xff]  ;;  %v357_v11 = vld [vmem:[%s336_s23 + $0x38] sm:$0xff]  ;;  %v358_v12 = vld [vmem:[%s336_s23 + $0x40] sm:$0xff] }
  0x11   : > { %v359_v14 = vld [vmem:[%s336_s23 + $0x48] sm:$0xff]  ;;  %v360_v15 = vld [vmem:[%s336_s23 + $0x50] sm:$0xff]  ;;  %v361_v16 = vld [vmem:[%s336_s23 + $0x58] sm:$0xff]  ;;  %537 = vmatpush.msra.mxu1 %v479_v19 }
  0x12   : > { %424 = vmatpush.msra.mxu0 %v363_v3  ;;  %v362_v18 = vld [vmem:[%s336_s23 + $0x60] sm:$0xff]  ;;  %v593_v28 = vld [vmem:[%s1581_s3 + $0x8] sm:$0xff] }
  0x13   : > { %1154 = vmatmul.msk.f32.vlgmr.msra.gmra.mxu0 %vm369_vm0, %v350_v4  ;;  %538 = vmatpush.msra.mxu1 %v478_v20  ;;  %v1245_v21 = vld [vmem:[%s1585_s7] ss:$0 sm:$0xff]  ;;  %v1246_v63 = vld [vmem:[%s1585_s7 + $0x1] ss:$0 sm:$0xff] }
  0x14   : > { %650 = vmatpush.msrb.mxu0 %v593_v28  ;;  %1234 = vmatpush.msra.mxu2 %v593_v28  ;;  %v592_v47 = vld [vmem:[%s1581_s3] sm:$0xff] }
  0x16   : > { %651 = vmatpush.msrb.mxu0 %v592_v47  ;;  %1235 = vmatpush.msra.mxu2 %v592_v47 }
  0x1b   : > { %1155 = vmatmul.msk.f32.gmra.mxu0 %vm369_vm0, %v351_v5 }
  0x23   : > { %1156 = vmatmul.msk.f32.gmra.mxu0 %vm369_vm0, %v352_v6 }
  0x2b   : > { %1157 = vmatmul.msk.f32.gmra.mxu0 %vm369_vm0, %v353_v7 }
  0x33   : > { %1158 = vmatmul.msk.f32.gmra.mxu0 %vm369_vm0, %v354_v8 }
  0x3b   : > { %1159 = vmatmul.msk.f32.gmra.mxu0 %vm369_vm0, %v355_v9  ;;  %v719_v9 = vld [vmem:[%s1582_s4] sm:$0xff] }
  0x3c   : > { %776 = vmatpush.msrb.mxu1 %v719_v9  ;;  %1236 = vmatpush.msra.mxu3 %v719_v9 }
  0x43   : > { %1160 = vmatmul.msk.f32.gmra.mxu0 %vm369_vm0, %v356_v10 }
  0x4b   : > { %1161 = vmatmul.msk.f32.gmra.mxu0 %vm369_vm0, %v357_v11 }
  0x53   : > { %1162 = vmatmul.msk.f32.gmra.mxu0 %vm369_vm0, %v358_v12 }
  0x5b   : > { %1163 = vmatmul.msk.f32.gmra.mxu0 %vm369_vm0, %v359_v14 }
  0x63   : > { %1164 = vmatmul.msk.f32.gmra.mxu0 %vm369_vm0, %v360_v15 }
  0x6b   : > { %1165 = vmatmul.msk.f32.gmra.mxu0 %vm369_vm0, %v361_v16 }
  0x73   : > { %1166 = vmatmul.msk.f32.gmra.mxu0 %vm369_vm0, %v362_v18 }
  0x90   : > { %v426_v22 = vpop.f32.mrf.mxu0 }
  0x91   : > { %v427_v23 = vadd.f32 %v1245_v21, %v426_v22 }
  0x93   : > { %v465_v24 = vmax.f32 %v427_v23, 0.0 }
  0x95   : > { %1167 = vmatmul.msk.f32.vlgmr.msra.gmra.mxu1 %vm369_vm0, %v465_v24 }
  0x98   : > { %v429_v25 = vpop.f32.mrf.mxu0 }
  0x99   : > { %v430_v26 = vadd.f32 %v1245_v21, %v429_v25 }
  0x9b   : > { %v466_v27 = vmax.f32 %v430_v26, 0.0 }
  0x9d   : > { %1168 = vmatmul.msk.f32.gmra.mxu1 %vm369_vm0, %v466_v27 }
  0xa0   : > { %v432_v29 = vpop.f32.mrf.mxu0 }
  0xa1   : > { %v433_v30 = vadd.f32 %v1245_v21, %v432_v29 }
  0xa3   : > { %v467_v31 = vmax.f32 %v433_v30, 0.0 }
  0xa5   : > { %1169 = vmatmul.msk.f32.gmra.mxu1 %vm369_vm0, %v467_v31 }
  0xa8   : > { %v435_v32 = vpop.f32.mrf.mxu0 }
  0xa9   : > { %v436_v33 = vadd.f32 %v1245_v21, %v435_v32 }
  0xab   : > { %v468_v34 = vmax.f32 %v436_v33, 0.0 }
  0xad   : > { %1170 = vmatmul.msk.f32.gmra.mxu1 %vm369_vm0, %v468_v34 }
  0xb0   : > { %v438_v35 = vpop.f32.mrf.mxu0 }
  0xb1   : > { %v439_v36 = vadd.f32 %v1245_v21, %v438_v35 }
  0xb3   : > { %v469_v37 = vmax.f32 %v439_v36, 0.0 }
  0xb5   : > { %1171 = vmatmul.msk.f32.gmra.mxu1 %vm369_vm0, %v469_v37 }
  0xb8   : > { %v441_v38 = vpop.f32.mrf.mxu0 }
  0xb9   : > { %v442_v39 = vadd.f32 %v1245_v21, %v441_v38 }
  0xbb   : > { %v470_v40 = vmax.f32 %v442_v39, 0.0 }
  0xbd   : > { %1172 = vmatmul.msk.f32.gmra.mxu1 %vm369_vm0, %v470_v40  ;;  %v1430_v40 = vld [vmem:[%s1585_s7 + $0x2] ss:$0 sm:$0xff] }
  0xc0   : > { %v444_v41 = vpop.f32.mrf.mxu0 }
  0xc1   : > { %v445_v42 = vadd.f32 %v1245_v21, %v444_v41 }
  0xc3   : > { %v471_v43 = vmax.f32 %v445_v42, 0.0 }
  0xc5   : > { %1173 = vmatmul.msk.f32.gmra.mxu1 %vm369_vm0, %v471_v43 }
  0xc8   : > { %v447_v44 = vpop.f32.mrf.mxu0 }
  0xc9   : > { %v448_v45 = vadd.f32 %v1245_v21, %v447_v44 }
  0xcb   : > { %v472_v46 = vmax.f32 %v448_v45, 0.0 }
  0xcd   : > { %1174 = vmatmul.msk.f32.gmra.mxu1 %vm369_vm0, %v472_v46 }
  0xd0   : > { %v450_v48 = vpop.f32.mrf.mxu0 }
  0xd1   : > { %v451_v49 = vadd.f32 %v1245_v21, %v450_v48 }
  0xd3   : > { %v473_v50 = vmax.f32 %v451_v49, 0.0 }
  0xd5   : > { %1175 = vmatmul.msk.f32.gmra.mxu1 %vm369_vm0, %v473_v50 }
  0xd8   : > { %v453_v51 = vpop.f32.mrf.mxu0 }
  0xd9   : > { %v454_v52 = vadd.f32 %v1245_v21, %v453_v51 }
  0xdb   : > { %v474_v53 = vmax.f32 %v454_v52, 0.0 }
  0xdd   : > { %1176 = vmatmul.msk.f32.gmra.mxu1 %vm369_vm0, %v474_v53 }
  0xe0   : > { %v456_v54 = vpop.f32.mrf.mxu0 }
  0xe1   : > { %v457_v55 = vadd.f32 %v1245_v21, %v456_v54 }
  0xe3   : > { %v475_v56 = vmax.f32 %v457_v55, 0.0 }
  0xe5   : > { %1177 = vmatmul.msk.f32.gmra.mxu1 %vm369_vm0, %v475_v56 }
  0xe8   : > { %v459_v57 = vpop.f32.mrf.mxu0 }
  0xe9   : > { %v460_v58 = vadd.f32 %v1245_v21, %v459_v57 }
  0xeb   : > { %v476_v59 = vmax.f32 %v460_v58, 0.0 }
  0xed   : > { %1178 = vmatmul.msk.f32.gmra.mxu1 %vm369_vm0, %v476_v59 }
  0xf0   : > { %v462_v60 = vpop.f32.mrf.mxu0 }
  0xf1   : > { %v463_v61 = vadd.f32 %v1245_v21, %v462_v60 }
  0xf3   : > { %v477_v62 = vmax.f32 %v463_v61, 0.0 }
  0xf5   : > { %1179 = vmatmul.msk.f32.gmra.mxu1 %vm369_vm0, %v477_v62 }
 0x112   : > { %v540_v0 = vpop.f32.mrf.mxu1 }
 0x113   : > { %v541_v1 = vadd.f32 %v1246_v63, %v540_v0 }
 0x115   : > { %v579_v2 = vmax.f32 %v541_v1, 0.0 }
 0x117   : > { %1180 = vmatmul.msk.f32.vlgmr.msrb.gmra.mxu0 %vm596_vm1, %v579_v2 }
 0x11a   : > { %v543_v3 = vpop.f32.mrf.mxu1 }
 0x11b   : > { %v544_v4 = vadd.f32 %v1246_v63, %v543_v3  ;;  %v831_v3 = vld [vmem:[%s1583_s5 + $0x8] sm:$0xff] }
 0x11c   : > { %887 = vmatpush.msrb.mxu3 %v831_v3 }
 0x11d   : > { %v580_v5 = vmax.f32 %v544_v4, 0.0 }
 0x11f   : > { %1181 = vmatmul.msk.f32.gmra.mxu0 %vm596_vm1, %v580_v5 }
 0x122   : > { %v546_v6 = vpop.f32.mrf.mxu1 }
 0x123   : > { %v547_v7 = vadd.f32 %v1246_v63, %v546_v6 }
 0x125   : > { %v581_v8 = vmax.f32 %v547_v7, 0.0  ;;  %v830_v7 = vld [vmem:[%s1583_s5] sm:$0xff] }
 0x126   : > { %888 = vmatpush.msrb.mxu3 %v830_v7 }
 0x127   : > { %1182 = vmatmul.msk.f32.gmra.mxu0 %vm596_vm1, %v581_v8 }
 0x12a   : > { %v549_v10 = vpop.f32.mrf.mxu1 }
 0x12b   : > { %v550_v11 = vadd.f32 %v1246_v63, %v549_v10 }
 0x12d   : > { %v582_v12 = vmax.f32 %v550_v11, 0.0 }
 0x12f   : > { %1183 = vmatmul.msk.f32.gmra.mxu0 %vm596_vm1, %v582_v12 }
 0x132   : > { %v552_v13 = vpop.f32.mrf.mxu1 }
 0x133   : > { %v553_v14 = vadd.f32 %v1246_v63, %v552_v13 }
 0x135   : > { %v583_v15 = vmax.f32 %v553_v14, 0.0 }
 0x137   : > { %1184 = vmatmul.msk.f32.gmra.mxu0 %vm596_vm1, %v583_v15 }
 0x13a   : > { %v555_v16 = vpop.f32.mrf.mxu1 }
 0x13b   : > { %v556_v17 = vadd.f32 %v1246_v63, %v555_v16 }
 0x13d   : > { %v584_v18 = vmax.f32 %v556_v17, 0.0 }
 0x13f   : > { %1185 = vmatmul.msk.f32.gmra.mxu0 %vm596_vm1, %v584_v18  ;;  %v1248_v18 = vld [vmem:[%s1585_s7 + $0x3] ss:$0 sm:$0xff] }
 0x142   : > { %v558_v19 = vpop.f32.mrf.mxu1 }
 0x143   : > { %v559_v20 = vadd.f32 %v1246_v63, %v558_v19 }
 0x145   : > { %v585_v21 = vmax.f32 %v559_v20, 0.0 }
 0x147   : > { %1186 = vmatmul.msk.f32.vlgmr.msra.gmra.mxu2 %vm596_vm1, %v585_v21 }
 0x14a   : > { %v561_v22 = vpop.f32.mrf.mxu1 }
 0x14b   : > { %v562_v23 = vadd.f32 %v1246_v63, %v561_v22 }
 0x14d   : > { %v586_v24 = vmax.f32 %v562_v23, 0.0 }
 0x14f   : > { %1187 = vmatmul.msk.f32.gmra.mxu2 %vm596_vm1, %v586_v24 }
 0x152   : > { %v564_v25 = vpop.f32.mrf.mxu1 }
 0x153   : > { %v565_v26 = vadd.f32 %v1246_v63, %v564_v25 }
 0x155   : > { %v587_v27 = vmax.f32 %v565_v26, 0.0 }
 0x157   : > { %1188 = vmatmul.msk.f32.gmra.mxu2 %vm596_vm1, %v587_v27 }
 0x15a   : > { %v567_v28 = vpop.f32.mrf.mxu1 }
 0x15b   : > { %v568_v29 = vadd.f32 %v1246_v63, %v567_v28 }
 0x15d   : > { %v588_v30 = vmax.f32 %v568_v29, 0.0 }
 0x15f   : > { %1189 = vmatmul.msk.f32.gmra.mxu2 %vm596_vm1, %v588_v30 }
 0x162   : > { %v570_v31 = vpop.f32.mrf.mxu1 }
 0x163   : > { %v571_v32 = vadd.f32 %v1246_v63, %v570_v31 }
 0x165   : > { %v589_v33 = vmax.f32 %v571_v32, 0.0 }
 0x167   : > { %1190 = vmatmul.msk.f32.gmra.mxu2 %vm596_vm1, %v589_v33 }
 0x16a   : > { %v573_v34 = vpop.f32.mrf.mxu1 }
 0x16b   : > { %v574_v35 = vadd.f32 %v1246_v63, %v573_v34 }
 0x16d   : > { %v590_v36 = vmax.f32 %v574_v35, 0.0 }
 0x16f   : > { %1191 = vmatmul.msk.f32.gmra.mxu2 %vm596_vm1, %v590_v36 }
 0x172   : > { %v576_v37 = vpop.f32.mrf.mxu1 }
 0x173   : > { %v577_v38 = vadd.f32 %v1246_v63, %v576_v37 }
 0x175   : > { %v591_v39 = vmax.f32 %v577_v38, 0.0 }
 0x177   : > { %1192 = vmatmul.msk.f32.gmra.mxu2 %vm596_vm1, %v591_v39 }
 0x194   : > { %v653_v41 = vpop.f32.mrf.mxu0 }
 0x195   : > { %v654_v42 = vadd.f32 %v1430_v40, %v653_v41 }
 0x197   : > { %1251 = vtanh.f32 %v654_v42 }
 0x19c   : > { %v656_v43 = vpop.f32.mrf.mxu0 }
 0x19d   : > { %v1252_v44 = vpop.eup %1251  ;;  %v657_v45 = vadd.f32 %v1430_v40, %v656_v43 }
 0x19e   : > { %706 = vst.msk [vmem:[%s1437_s27] sm:$0xff] %vm705_vm2, %v1252_v44  ;;  %1193 = vmatmul.msk.f32.vlgmr.msrb.gmra.mxu1 %vm705_vm2, %v1252_v44 }
 0x19f   : > { %1253 = vtanh.f32 %v657_v45 }
 0x1a4   : > { %v659_v46 = vpop.f32.mrf.mxu0 }
 0x1a5   : > { %v1254_v47 = vpop.eup %1253  ;;  %v660_v48 = vadd.f32 %v1430_v40, %v659_v46 }
 0x1a6   : > { %707 = vst.msk [vmem:[%s1437_s27 + $0x8] sm:$0xff] %vm705_vm2, %v1254_v47  ;;  %1194 = vmatmul.msk.f32.gmra.mxu1 %vm705_vm2, %v1254_v47  ;;  %v944_v47 = vld [vmem:[%s1584_s6 + $0x10] sm:$0xff] }
 0x1a7   : > { %1255 = vtanh.f32 %v660_v48  ;;  %v943_v48 = vld [vmem:[%s1584_s6 + $0x8] sm:$0xff] }
 0x1ac   : > { %v662_v49 = vpop.f32.mrf.mxu0 }
 0x1ad   : > { %v1256_v50 = vpop.eup %1255  ;;  %v663_v51 = vadd.f32 %v1430_v40, %v662_v49 }
 0x1ae   : > { %708 = vst.msk [vmem:[%s1437_s27 + $0x10] sm:$0xff] %vm705_vm2, %v1256_v50  ;;  %1195 = vmatmul.msk.f32.gmra.mxu1 %vm705_vm2, %v1256_v50 }
 0x1af   : > { %1257 = vtanh.f32 %v663_v51 }
 0x1b4   : > { %v665_v52 = vpop.f32.mrf.mxu0 }
 0x1b5   : > { %v1258_v53 = vpop.eup %1257  ;;  %v666_v54 = vadd.f32 %v1430_v40, %v665_v52 }
 0x1b6   : > { %709 = vst.msk [vmem:[%s1437_s27 + $0x18] sm:$0xff] %vm705_vm2, %v1258_v53  ;;  %1196 = vmatmul.msk.f32.gmra.mxu1 %vm705_vm2, %v1258_v53 }
 0x1b7   : > { %1259 = vtanh.f32 %v666_v54 }
 0x1bc   : > { %v668_v55 = vpop.f32.mrf.mxu0 }
 0x1bd   : > { %v1260_v56 = vpop.eup %1259  ;;  %v669_v57 = vadd.f32 %v1430_v40, %v668_v55 }
 0x1be   : > { %710 = vst.msk [vmem:[%s1437_s27 + $0x20] sm:$0xff] %vm705_vm2, %v1260_v56  ;;  %1197 = vmatmul.msk.f32.gmra.mxu1 %vm705_vm2, %v1260_v56 }
 0x1bf   : > { %1261 = vtanh.f32 %v669_v57 }
 0x1c5   : > { %v1262_v58 = vpop.eup %1261 }
 0x1c6   : > { %711 = vst.msk [vmem:[%s1437_s27 + $0x28] sm:$0xff] %vm705_vm2, %v1262_v58  ;;  %1198 = vmatmul.msk.f32.gmra.mxu1 %vm705_vm2, %v1262_v58  ;;  %v942_v58 = vld [vmem:[%s1584_s6] sm:$0xff] }
 0x1ca   : > { %v671_v59 = vpop.f32.mrf.mxu2 }
 0x1cb   : > { %v672_v60 = vadd.f32 %v1430_v40, %v671_v59 }
 0x1cd   : > { %1263 = vtanh.f32 %v672_v60 }
 0x1d2   : > { %v674_v61 = vpop.f32.mrf.mxu2 }
 0x1d3   : > { %v1264_v62 = vpop.eup %1263  ;;  %v675_v63 = vadd.f32 %v1430_v40, %v674_v61 }
 0x1d4   : > { %712 = vst.msk [vmem:[%s1437_s27 + $0x30] sm:$0xff] %vm705_vm2, %v1264_v62  ;;  %1199 = vmatmul.msk.f32.vlgmr.msra.gmra.mxu3 %vm705_vm2, %v1264_v62  ;;  %v1249_v62 = vld [vmem:[%s1585_s7 + $0x4] ss:$0 sm:$0xff] }
 0x1d5   : > { %1265 = vtanh.f32 %v675_v63 }
 0x1da   : > { %v677_v0 = vpop.f32.mrf.mxu2 }
 0x1db   : > { %v1266_v1 = vpop.eup %1265  ;;  %v678_v2 = vadd.f32 %v1430_v40, %v677_v0 }
 0x1dc   : > { %713 = vst.msk [vmem:[%s1437_s27 + $0x38] sm:$0xff] %vm705_vm2, %v1266_v1  ;;  %1200 = vmatmul.msk.f32.gmra.mxu3 %vm705_vm2, %v1266_v1 }
 0x1dd   : > { %1267 = vtanh.f32 %v678_v2 }
 0x1e2   : > { %v680_v4 = vpop.f32.mrf.mxu2 }
 0x1e3   : > { %v1268_v5 = vpop.eup %1267  ;;  %v681_v6 = vadd.f32 %v1430_v40, %v680_v4 }
 0x1e4   : > { %714 = vst.msk [vmem:[%s1437_s27 + $0x40] sm:$0xff] %vm705_vm2, %v1268_v5  ;;  %1201 = vmatmul.msk.f32.gmra.mxu3 %vm705_vm2, %v1268_v5 }
 0x1e5   : > { %1269 = vtanh.f32 %v681_v6 }
 0x1ea   : > { %v683_v8 = vpop.f32.mrf.mxu2 }
 0x1eb   : > { %v1270_v9 = vpop.eup %1269  ;;  %v684_v10 = vadd.f32 %v1430_v40, %v683_v8 }
 0x1ec   : > { %715 = vst.msk [vmem:[%s1437_s27 + $0x48] sm:$0xff] %vm705_vm2, %v1270_v9  ;;  %1202 = vmatmul.msk.f32.gmra.mxu3 %vm705_vm2, %v1270_v9 }
 0x1ed   : > { %1271 = vtanh.f32 %v684_v10 }
 0x1f2   : > { %v686_v11 = vpop.f32.mrf.mxu2 }
 0x1f3   : > { %v1272_v12 = vpop.eup %1271  ;;  %v687_v13 = vadd.f32 %v1430_v40, %v686_v11 }
 0x1f4   : > { %716 = vst.msk [vmem:[%s1437_s27 + $0x50] sm:$0xff] %vm705_vm2, %v1272_v12  ;;  %1203 = vmatmul.msk.f32.gmra.mxu3 %vm705_vm2, %v1272_v12 }
 0x1f5   : > { %1273 = vtanh.f32 %v687_v13 }
 0x1fa   : > { %v689_v14 = vpop.f32.mrf.mxu2 }
 0x1fb   : > { %v1274_v15 = vpop.eup %1273  ;;  %v690_v16 = vadd.f32 %v1430_v40, %v689_v14  ;;  %v945_v40 = vld [vmem:[%s1584_s6 + $0x18] sm:$0xff] }
 0x1fc   : > { %717 = vst.msk [vmem:[%s1437_s27 + $0x58] sm:$0xff] %vm705_vm2, %v1274_v15  ;;  %1204 = vmatmul.msk.f32.gmra.mxu3 %vm705_vm2, %v1274_v15  ;;  %999 = vmatpush.msrb.mxu2 %v945_v40 }
 0x1fd   : > { %1275 = vtanh.f32 %v690_v16 }
 0x1fe   : > { %1000 = vmatpush.msrb.mxu2 %v944_v47 }
 0x200   : > { %1001 = vmatpush.msrb.mxu2 %v943_v48 }
 0x202   : > { %1002 = vmatpush.msrb.mxu2 %v942_v58 }
 0x203   : > { %v1276_v17 = vpop.eup %1275 }
 0x204   : > { %718 = vst.msk [vmem:[%s1437_s27 + $0x60] sm:$0xff] %vm705_vm2, %v1276_v17  ;;  %1205 = vmatmul.msk.f32.gmra.mxu3 %vm705_vm2, %v1276_v17 }
 0x21b   : > { %v778_v19 = vpop.f32.mrf.mxu1 }
 0x21c   : > { %v779_v20 = vadd.f32 %v1248_v18, %v778_v19 }
 0x21e   : > { %v817_v21 = vmax.f32 %v779_v20, 0.0 }
 0x220   : > { %1206 = vmatmul.msk.f32.vlgmr.msrb.gmra.mxu3 %vm596_vm1, %v817_v21 }
 0x223   : > { %v781_v22 = vpop.f32.mrf.mxu1 }
 0x224   : > { %v782_v23 = vadd.f32 %v1248_v18, %v781_v22 }
 0x226   : > { %v818_v24 = vmax.f32 %v782_v23, 0.0 }
 0x228   : > { %1207 = vmatmul.msk.f32.gmra.mxu3 %vm596_vm1, %v818_v24 }
 0x22b   : > { %v784_v25 = vpop.f32.mrf.mxu1 }
 0x22c   : > { %v785_v26 = vadd.f32 %v1248_v18, %v784_v25 }
 0x22e   : > { %v819_v27 = vmax.f32 %v785_v26, 0.0 }
 0x230   : > { %1208 = vmatmul.msk.f32.gmra.mxu3 %vm596_vm1, %v819_v27 }
 0x233   : > { %v787_v28 = vpop.f32.mrf.mxu1 }
 0x234   : > { %v788_v29 = vadd.f32 %v1248_v18, %v787_v28 }
 0x236   : > { %v820_v30 = vmax.f32 %v788_v29, 0.0 }
 0x238   : > { %1209 = vmatmul.msk.f32.gmra.mxu3 %vm596_vm1, %v820_v30 }
 0x23b   : > { %v790_v31 = vpop.f32.mrf.mxu1 }
 0x23c   : > { %v791_v32 = vadd.f32 %v1248_v18, %v790_v31 }
 0x23e   : > { %v821_v33 = vmax.f32 %v791_v32, 0.0 }
 0x240   : > { %1210 = vmatmul.msk.f32.gmra.mxu3 %vm596_vm1, %v821_v33 }
 0x243   : > { %v793_v34 = vpop.f32.mrf.mxu1 }
 0x244   : > { %v794_v35 = vadd.f32 %v1248_v18, %v793_v34 }
 0x246   : > { %v822_v36 = vmax.f32 %v794_v35, 0.0 }
 0x248   : > { %1211 = vmatmul.msk.f32.gmra.mxu3 %vm596_vm1, %v822_v36 }
 0x257   : > { %v796_v37 = vpop.f32.mrf.mxu3 }
 0x258   : > { %v797_v38 = vadd.f32 %v1248_v18, %v796_v37 }
 0x25a   : > { %v823_v39 = vmax.f32 %v797_v38, 0.0  ;;  %v1250_v38 = vld [vmem:[%s1585_s7 + $0x5] ss:$0 sm:$0xff] }
 0x25c   : > { %1212 = vmatmul.msk.f32.gmra.mxu3 %vm596_vm1, %v823_v39 }
 0x25f   : > { %v799_v41 = vpop.f32.mrf.mxu3 }
 0x260   : > { %v800_v42 = vadd.f32 %v1248_v18, %v799_v41 }
 0x262   : > { %v824_v43 = vmax.f32 %v800_v42, 0.0 }
 0x264   : > { %1213 = vmatmul.msk.f32.gmra.mxu3 %vm596_vm1, %v824_v43 }
 0x267   : > { %v802_v44 = vpop.f32.mrf.mxu3 }
 0x268   : > { %v803_v45 = vadd.f32 %v1248_v18, %v802_v44 }
 0x26a   : > { %v825_v46 = vmax.f32 %v803_v45, 0.0 }
 0x26c   : > { %1214 = vmatmul.msk.f32.gmra.mxu3 %vm596_vm1, %v825_v46 }
 0x26f   : > { %v805_v49 = vpop.f32.mrf.mxu3 }
 0x270   : > { %v806_v50 = vadd.f32 %v1248_v18, %v805_v49 }
 0x272   : > { %v826_v51 = vmax.f32 %v806_v50, 0.0 }
 0x274   : > { %1215 = vmatmul.msk.f32.gmra.mxu3 %vm596_vm1, %v826_v51 }
 0x277   : > { %v808_v52 = vpop.f32.mrf.mxu3 }
 0x278   : > { %v809_v53 = vadd.f32 %v1248_v18, %v808_v52 }
 0x27a   : > { %v827_v54 = vmax.f32 %v809_v53, 0.0 }
 0x27c   : > { %1216 = vmatmul.msk.f32.gmra.mxu3 %vm596_vm1, %v827_v54 }
 0x27f   : > { %v811_v55 = vpop.f32.mrf.mxu3 }
 0x280   : > { %v812_v56 = vadd.f32 %v1248_v18, %v811_v55 }
 0x282   : > { %v828_v57 = vmax.f32 %v812_v56, 0.0 }
 0x284   : > { %1217 = vmatmul.msk.f32.gmra.mxu3 %vm596_vm1, %v828_v57 }
 0x287   : > { %v814_v59 = vpop.f32.mrf.mxu3 }
 0x288   : > { %v815_v60 = vadd.f32 %v1248_v18, %v814_v59 }
 0x28a   : > { %v829_v61 = vmax.f32 %v815_v60, 0.0 }
 0x28c   : > { %1218 = vmatmul.msk.f32.gmra.mxu3 %vm596_vm1, %v829_v61 }
 0x2a3   : > { %v890_v63 = vpop.f32.mrf.mxu3 }
 0x2a4   : > { %v891_v0 = vadd.f32 %v1249_v62, %v890_v63 }
 0x2a6   : > { %v929_v1 = vmax.f32 %v891_v0, 0.0 }
 0x2a8   : > { %1219 = vmatmul.msk.f32.vlgmr.msrb.gmra.mxu2 %vm369_vm0, %v929_v1 }
 0x2ab   : > { %v893_v2 = vpop.f32.mrf.mxu3 }
 0x2ac   : > { %v894_v3 = vadd.f32 %v1249_v62, %v893_v2 }
 0x2ae   : > { %v930_v4 = vmax.f32 %v894_v3, 0.0 }
 0x2b0   : > { %1220 = vmatmul.msk.f32.gmra.mxu2 %vm369_vm0, %v930_v4 }
 0x2b3   : > { %v896_v5 = vpop.f32.mrf.mxu3 }
 0x2b4   : > { %v897_v6 = vadd.f32 %v1249_v62, %v896_v5 }
 0x2b6   : > { %v931_v7 = vmax.f32 %v897_v6, 0.0 }
 0x2b8   : > { %1221 = vmatmul.msk.f32.gmra.mxu2 %vm369_vm0, %v931_v7 }
 0x2bb   : > { %v899_v8 = vpop.f32.mrf.mxu3 }
 0x2bc   : > { %v900_v9 = vadd.f32 %v1249_v62, %v899_v8 }
 0x2be   : > { %v932_v10 = vmax.f32 %v900_v9, 0.0 }
 0x2c0   : > { %1222 = vmatmul.msk.f32.gmra.mxu2 %vm369_vm0, %v932_v10 }
 0x2c3   : > { %v902_v11 = vpop.f32.mrf.mxu3 }
 0x2c4   : > { %v903_v12 = vadd.f32 %v1249_v62, %v902_v11 }
 0x2c6   : > { %v933_v13 = vmax.f32 %v903_v12, 0.0 }
 0x2c8   : > { %1223 = vmatmul.msk.f32.gmra.mxu2 %vm369_vm0, %v933_v13 }
 0x2cb   : > { %v905_v14 = vpop.f32.mrf.mxu3 }
 0x2cc   : > { %v906_v15 = vadd.f32 %v1249_v62, %v905_v14 }
 0x2ce   : > { %v934_v16 = vmax.f32 %v906_v15, 0.0 }
 0x2d0   : > { %1224 = vmatmul.msk.f32.gmra.mxu2 %vm369_vm0, %v934_v16 }
 0x2df   : > { %v908_v17 = vpop.f32.mrf.mxu3 }
 0x2e0   : > { %v909_v18 = vadd.f32 %v1249_v62, %v908_v17 }
 0x2e2   : > { %v935_v19 = vmax.f32 %v909_v18, 0.0 }
 0x2e4   : > { %1225 = vmatmul.msk.f32.gmra.mxu2 %vm369_vm0, %v935_v19 }
 0x2e7   : > { %v911_v20 = vpop.f32.mrf.mxu3 }
 0x2e8   : > { %v912_v21 = vadd.f32 %v1249_v62, %v911_v20 }
 0x2ea   : > { %v936_v22 = vmax.f32 %v912_v21, 0.0 }
 0x2ec   : > { %1226 = vmatmul.msk.f32.gmra.mxu2 %vm369_vm0, %v936_v22 }
 0x2ef   : > { %v914_v23 = vpop.f32.mrf.mxu3 }
 0x2f0   : > { %v915_v24 = vadd.f32 %v1249_v62, %v914_v23 }
 0x2f2   : > { %v937_v25 = vmax.f32 %v915_v24, 0.0 }
 0x2f4   : > { %1227 = vmatmul.msk.f32.gmra.mxu2 %vm369_vm0, %v937_v25 }
 0x2f7   : > { %v917_v26 = vpop.f32.mrf.mxu3 }
 0x2f8   : > { %v918_v27 = vadd.f32 %v1249_v62, %v917_v26 }
 0x2fa   : > { %v938_v28 = vmax.f32 %v918_v27, 0.0 }
 0x2fc   : > { %1228 = vmatmul.msk.f32.gmra.mxu2 %vm369_vm0, %v938_v28 }
 0x2ff   : > { %v920_v29 = vpop.f32.mrf.mxu3 }
 0x300   : > { %v921_v30 = vadd.f32 %v1249_v62, %v920_v29 }
 0x302   : > { %v939_v31 = vmax.f32 %v921_v30, 0.0 }
 0x304   : > { %1229 = vmatmul.msk.f32.gmra.mxu2 %vm369_vm0, %v939_v31 }
 0x307   : > { %v923_v32 = vpop.f32.mrf.mxu3 }
 0x308   : > { %v924_v33 = vadd.f32 %v1249_v62, %v923_v32 }
 0x30a   : > { %v940_v34 = vmax.f32 %v924_v33, 0.0 }
 0x30c   : > { %1230 = vmatmul.msk.f32.gmra.mxu2 %vm369_vm0, %v940_v34 }
 0x30f   : > { %v926_v35 = vpop.f32.mrf.mxu3 }
 0x310   : > { %v927_v36 = vadd.f32 %v1249_v62, %v926_v35 }
 0x312   : > { %v941_v37 = vmax.f32 %v927_v36, 0.0 }
 0x314   : > { %1231 = vmatmul.msk.f32.gmra.mxu2 %vm369_vm0, %v941_v37 }
 0x32b   : > { %v1004_v39 = vpop.f32.mrf.mxu2 }
 0x32c   : > { %v1005_v40 = vadd.f32 %v1250_v38, %v1004_v39 }
 0x32e   : > { %1043 = vst.msk [vmem:[%s1547_s29] sm:$0xff] %vm369_vm0, %v1005_v40 }
 0x333   : > { %v1007_v41 = vpop.f32.mrf.mxu2 }
 0x334   : > { %v1008_v42 = vadd.f32 %v1250_v38, %v1007_v41 }
 0x336   : > { %1044 = vst.msk [vmem:[%s1547_s29 + $0x8] sm:$0xff] %vm369_vm0, %v1008_v42 }
 0x33b   : > { %v1010_v43 = vpop.f32.mrf.mxu2 }
 0x33c   : > { %v1011_v44 = vadd.f32 %v1250_v38, %v1010_v43 }
 0x33e   : > { %1045 = vst.msk [vmem:[%s1547_s29 + $0x10] sm:$0xff] %vm369_vm0, %v1011_v44 }
 0x343   : > { %v1013_v45 = vpop.f32.mrf.mxu2 }
 0x344   : > { %v1014_v46 = vadd.f32 %v1250_v38, %v1013_v45 }
 0x346   : > { %1046 = vst.msk [vmem:[%s1547_s29 + $0x18] sm:$0xff] %vm369_vm0, %v1014_v46 }
 0x34b   : > { %v1016_v47 = vpop.f32.mrf.mxu2 }
 0x34c   : > { %v1017_v48 = vadd.f32 %v1250_v38, %v1016_v47 }
 0x34e   : > { %1047 = vst.msk [vmem:[%s1547_s29 + $0x20] sm:$0xff] %vm369_vm0, %v1017_v48 }
 0x353   : > { %v1019_v49 = vpop.f32.mrf.mxu2 }
 0x354   : > { %v1020_v50 = vadd.f32 %v1250_v38, %v1019_v49 }
 0x356   : > { %1048 = vst.msk [vmem:[%s1547_s29 + $0x28] sm:$0xff] %vm369_vm0, %v1020_v50 }
 0x367   : > { %v1022_v51 = vpop.f32.mrf.mxu2 }
 0x368   : > { %v1023_v52 = vadd.f32 %v1250_v38, %v1022_v51 }
 0x36a   : > { %1049 = vst.msk [vmem:[%s1547_s29 + $0x30] sm:$0xff] %vm369_vm0, %v1023_v52 }
 0x36f   : > { %v1025_v53 = vpop.f32.mrf.mxu2 }
 0x370   : > { %v1026_v54 = vadd.f32 %v1250_v38, %v1025_v53 }
 0x372   : > { %1050 = vst.msk [vmem:[%s1547_s29 + $0x38] sm:$0xff] %vm369_vm0, %v1026_v54 }
 0x377   : > { %v1028_v55 = vpop.f32.mrf.mxu2 }
 0x378   : > { %v1029_v56 = vadd.f32 %v1250_v38, %v1028_v55 }
 0x37a   : > { %1051 = vst.msk [vmem:[%s1547_s29 + $0x40] sm:$0xff] %vm369_vm0, %v1029_v56 }
 0x37f   : > { %v1031_v57 = vpop.f32.mrf.mxu2 }
 0x380   : > { %v1032_v58 = vadd.f32 %v1250_v38, %v1031_v57 }
 0x382   : > { %1052 = vst.msk [vmem:[%s1547_s29 + $0x48] sm:$0xff] %vm369_vm0, %v1032_v58 }
 0x387   : > { %v1034_v59 = vpop.f32.mrf.mxu2 }
 0x388   : > { %v1035_v60 = vadd.f32 %v1250_v38, %v1034_v59 }
 0x38a   : > { %1053 = vst.msk [vmem:[%s1547_s29 + $0x50] sm:$0xff] %vm369_vm0, %v1035_v60 }
 0x38f   : > { %v1037_v61 = vpop.f32.mrf.mxu2 }
 0x390   : > { %v1038_v62 = vadd.f32 %v1250_v38, %v1037_v61 }
 0x392   : > { %1054 = vst.msk [vmem:[%s1547_s29 + $0x58] sm:$0xff] %vm369_vm0, %v1038_v62 }
 0x397   : > { %v1040_v63 = vpop.f32.mrf.mxu2 }
 0x398   : > { %v1041_v0 = vadd.f32 %v1250_v38, %v1040_v63 }
 0x39a   : > { %1055 = vst.msk [vmem:[%s1547_s29 + $0x60] sm:$0xff] %vm369_vm0, %v1041_v0 }
 0x39b PF: > { %s20_s30 = sadd.s32 1, %s1283_s30  }
 0x39c   : > { %p17_p4 = scmp.ge.s32.totalorder %s20_s30, 4  }
 0x39e   :  { %19 = sbr.rel (!%p17_p4) target bundleno = 1 (0x1), region = 94 }

</bundles_post_ra>
